<compile_context>
chip_gen: v5e
topology: v5e:2x2
jax: 0.10.0
libtpu: 0.0.40
codegen_flags: <defaults>
</compile_context>

<pallas_src>
import math
import functools

import jax
import jax.numpy as jnp
from jax.experimental import pallas as pl
from jax.experimental.pallas import tpu as pltpu


def _arcface_kernel(labels_ref, logits_ref, out_ref, *,
                    scale, cos_m, sin_m, theta, sinmm, easy_margin, tc):
    """Elementwise margin adjustment on one (tm, tc) tile of the logits."""
    j = pl.program_id(1)                            # class-tile index (innermost axis)

    t = logits_ref[...].astype(jnp.float32)         # compute in f32 regardless of I/O dtype
    labels_local = labels_ref[...] - j * tc         # (tm, 1): tile-local target column;
                                                    # label == -1 / other tiles -> outside [0, tc)

    col = jax.lax.broadcasted_iota(jnp.int32, t.shape, 1)
    is_target = col == labels_local                 # never true for ignored / foreign-tile labels

    sin_theta = jnp.sqrt(1.0 - t * t)               # NaN for |t| > 1 (faithful to torch.sqrt)
    cos_theta_m = t * cos_m - sin_theta * sin_m
    if easy_margin:
        final_target = jnp.where(t > 0.0, cos_theta_m, t)
    else:
        final_target = jnp.where(t > theta, cos_theta_m, t - sinmm)

    out_ref[...] = (jnp.where(is_target, final_target, t) * scale).astype(out_ref.dtype)


def arcface(logits, labels, *, s=64.0, margin=0.5, easy_margin=False,
            block_rows=256, block_cols=2048):
    """logits: (N, C) cosine logits (any float dtype); labels: (N,) int, -1 = ignore.
    Returns margin-adjusted, scaled logits of shape (N, C) in logits.dtype."""
    N, C = logits.shape
    assert labels.shape == (N,)

    # Tile sizes: multiple of (8, 128) or the full dim; partial edge blocks are fine
    # for this elementwise kernel (OOB stores are masked by Pallas).
    tm = block_rows if N >= block_rows else N
    if C >= 4096:
        tc = 4096
    elif C >= block_cols:
        tc = block_cols
    else:
        tc = C

    labels_2d = labels.astype(jnp.int32).reshape(N, 1)

    cos_m = math.cos(margin)
    sin_m = math.sin(margin)
    theta = math.cos(math.pi - margin)
    sinmm = math.sin(math.pi - margin) * margin

    kernel = functools.partial(
        _arcface_kernel,
        scale=float(s), cos_m=cos_m, sin_m=sin_m, theta=theta, sinmm=sinmm,
        easy_margin=bool(easy_margin), tc=tc)

    # Scoped-VMEM sized from the real footprint: double-buffered logits in + out + labels.
    itemsize = jnp.dtype(logits.dtype).itemsize
    tile_bytes = tm * tc * itemsize
    vmem_bytes = 2 * (2 * tile_bytes + tm * 4) + (2 << 20)         # + headroom
    vmem_bytes = int(min(max(vmem_bytes, 4 << 20), 32 << 20))      # portable on v7x (64 MiB VMEM)

    return pl.pallas_call(
        kernel,
        out_shape=jax.ShapeDtypeStruct((N, C), logits.dtype),
        grid=(pl.cdiv(N, tm), pl.cdiv(C, tc)),
        in_specs=[
            pl.BlockSpec((tm, 1), lambda i, j: (i, 0)),    # per-row labels, constant across j
            pl.BlockSpec((tm, tc), lambda i, j: (i, j)),   # logits tile (lane-dense)
        ],
        out_specs=pl.BlockSpec((tm, tc), lambda i, j: (i, j)),
        input_output_aliases={1: 0},                       # in-place like torch; XLA copies if not donated
        compiler_params=pltpu.CompilerParams(
            dimension_semantics=("parallel", "parallel"),
            vmem_limit_bytes=vmem_bytes),
    )(labels_2d, logits)


def _reference(logits, labels, s, margin, easy_margin=False):
    """Plain-JAX functional transcription of ArcFace.forward."""
    cos_m, sin_m = math.cos(margin), math.sin(margin)
    theta = math.cos(math.pi - margin)
    sinmm = math.sin(math.pi - margin) * margin
    C = logits.shape[1]
    one_hot = (labels[:, None] == jnp.arange(C)[None, :]) & (labels[:, None] >= 0)
    t = logits.astype(jnp.float32)
    sin_t = jnp.sqrt(1.0 - t * t)
    cos_t_m = t * cos_m - sin_t * sin_m
    if easy_margin:
        final_t = jnp.where(t > 0.0, cos_t_m, t)
    else:
        final_t = jnp.where(t > theta, cos_t_m, t - sinmm)
    return (jnp.where(one_hot, final_t, t) * s).astype(logits.dtype)


if __name__ == "__main__":
    key = jax.random.PRNGKey(0)
    k1, k2, k3, k4 = jax.random.split(key, 4)

    s, margin = 64.0, 0.5

    # Case 1: small shapes, tile == full array (no edge blocks).
    N, C = 8, 512
    logits = jax.random.uniform(k1, (N, C), jnp.float32, minval=-0.99, maxval=0.99)
    labels = jax.random.randint(k2, (N,), 0, C).astype(jnp.int32)
    labels = labels.at[3].set(-1)
    labels = labels.at[6].set(-1)

    ref = _reference(logits, labels, s, margin)                  # computed before the kernel call
    out = jax.block_until_ready(arcface(logits, labels, s=s, margin=margin))
    assert out.shape == (N, C) and out.dtype == logits.dtype
    err = float(jnp.max(jnp.abs(out - ref)))
    assert jnp.allclose(out, ref, rtol=1e-5, atol=1e-5), err

    # Case 2: non-divisible shapes -> exercises partial edge blocks (masked OOB writes).
    N2, C2 = 10, 200
    logits2 = jax.random.uniform(k3, (N2, C2), jnp.float32, minval=-0.99, maxval=0.99)
    labels2 = jax.random.randint(k4, (N2,), 0, C2).astype(jnp.int32)
    labels2 = labels2.at[0].set(-1)

    ref2 = _reference(logits2, labels2, s, margin)
    out2 = jax.block_until_ready(
        arcface(logits2, labels2, s=s, margin=margin, block_rows=8, block_cols=128))
    err2 = float(jnp.max(jnp.abs(out2 - ref2)))
    assert jnp.allclose(out2, ref2, rtol=1e-5, atol=1e-5), err2

    print("KERNEL_OK")
</pallas_src>

<mosaic_0001>
module attributes {stable_mosaic.version = 11 : i64} {
  func.func @_arcface_kernel(%arg0: i32, %arg1: i32, %arg2: memref<8x1xi32, #tpu.memory_space<vmem>>, %arg3: memref<8x512xf32, #tpu.memory_space<vmem>>, %arg4: memref<8x512xf32, #tpu.memory_space<vmem>>) attributes {dimension_semantics = [#tpu.dimension_semantics<parallel>, #tpu.dimension_semantics<parallel>], iteration_bounds = array<i64: 1, 1>, scalar_prefetch = 0 : i64, scratch_operands = 0 : i64, tpu.core_type = #tpu.core_type<tc>, window_params = [{transform_indices = @transform_0, window_bounds = array<i64: 8, 1>}, {transform_indices = @transform_1, window_bounds = array<i64: 8, 512>}, {transform_indices = @transform_2, window_bounds = array<i64: 8, 512>}]} {
    %c0 = arith.constant 0 : index
    %c0_0 = arith.constant 0 : index
    %0 = vector.load %arg3[%c0, %c0_0] : memref<8x512xf32, #tpu.memory_space<vmem>>, vector<8x512xf32>
    %c0_1 = arith.constant 0 : index
    %c0_2 = arith.constant 0 : index
    %1 = vector.load %arg2[%c0_1, %c0_2] : memref<8x1xi32, #tpu.memory_space<vmem>>, vector<8x1xi32>
    %c512_i32 = arith.constant 512 : i32
    %2 = arith.muli %arg1, %c512_i32 : i32
    %3 = vector.broadcast %2 : i32 to vector<8x1xi32>
    %4 = arith.subi %1, %3 : vector<8x1xi32>
    %5 = tpu.iota {dimensions = array<i32: 1>} : vector<8x512xi32>
    %6 = vector.broadcast %4 : vector<8x1xi32> to vector<8x512xi32>
    %7 = arith.cmpi eq, %5, %6 : vector<8x512xi32>
    %8 = arith.mulf %0, %0 : vector<8x512xf32>
    %cst = arith.constant 1.000000e+00 : f32
    %9 = vector.broadcast %cst : f32 to vector<8x512xf32>
    %10 = arith.subf %9, %8 : vector<8x512xf32>
    %11 = math.sqrt %10 : vector<8x512xf32>
    %cst_3 = arith.constant 0.87758255 : f32
    %12 = vector.broadcast %cst_3 : f32 to vector<8x512xf32>
    %13 = arith.mulf %0, %12 : vector<8x512xf32>
    %cst_4 = arith.constant 0.47942555 : f32
    %14 = vector.broadcast %cst_4 : f32 to vector<8x512xf32>
    %15 = arith.mulf %11, %14 : vector<8x512xf32>
    %16 = arith.subf %13, %15 : vector<8x512xf32>
    %cst_5 = arith.constant -0.87758255 : f32
    %17 = vector.broadcast %cst_5 : f32 to vector<8x512xf32>
    %18 = arith.cmpf ogt, %0, %17 : vector<8x512xf32>
    %cst_6 = arith.constant 0.239712775 : f32
    %19 = vector.broadcast %cst_6 : f32 to vector<8x512xf32>
    %20 = arith.subf %0, %19 : vector<8x512xf32>
    %21 = arith.select %18, %16, %20 : vector<8x512xi1>, vector<8x512xf32>
    %22 = arith.select %7, %21, %0 : vector<8x512xi1>, vector<8x512xf32>
    %cst_7 = arith.constant 6.400000e+01 : f32
    %23 = vector.broadcast %cst_7 : f32 to vector<8x512xf32>
    %24 = arith.mulf %22, %23 : vector<8x512xf32>
    %c0_8 = arith.constant 0 : index
    %c0_9 = arith.constant 0 : index
    %25 = vector.load %arg4[%c0_8, %c0_9] : memref<8x512xf32, #tpu.memory_space<vmem>>, vector<8x512xf32>
    tpu.vector_store %arg4[%c0_8, %c0_9], %24 {strides = array<i32>} : memref<8x512xf32, #tpu.memory_space<vmem>>, vector<8x512xf32>,
    return
  }
  func.func @transform_0(%arg0: i32, %arg1: i32) -> (i32, i32) {
    %c0_i32 = arith.constant 0 : i32
    %c0_i32_0 = arith.constant 0 : i32
    return %arg0, %c0_i32 : i32, i32
  }
  func.func @transform_1(%arg0: i32, %arg1: i32) -> (i32, i32) {
    %c0_i32 = arith.constant 0 : i32
    return %arg0, %arg1 : i32, i32
  }
  func.func @transform_2(%arg0: i32, %arg1: i32) -> (i32, i32) {
    %c0_i32 = arith.constant 0 : i32
    return %arg0, %arg1 : i32, i32
  }
}

</mosaic_0001>

<bundles_post_ra>
// kernel: tpu_custom_call.1
= control target key start
LH: loop header
LB: loop body
LE: loop exit
PB: predicated region body
PF: predicated region fallthrough
CT: control target
= control target key end

     0   :  { %7 = vsyncpa [#allocation3], 0  ;;  %s282_s0 = inlined_call_operand.vmem [shape: s32[8,1], index: 0, kind: input, shape index: {}]   ;;  %s283_s1 = inlined_call_operand.hbm [shape: f32[8,512], index: 1, kind: input, shape index: {}, may-alias: {1,2}]   ;;  %s284_s2 = inlined_call_operand.hbm [shape: f32[8,512], index: 2, kind: output, shape index: {}, may-alias: {1,2}]  }
   0x1   :  { %8 = vsyncpa [#allocation4], 0  ;;  %s16_s11 = sshll.u32 %s283_s1, 4  ;;  %s223_s12 = smov [#allocation2]   ;;  %s17_s11 = int_to_ptr.hbm [resolvable:$true] %s16_s11 }
   0x2   :  { %s18_s13 = sshll.u32 %s223_s12, 4  ;;  %s19_s13 = int_to_ptr.vmem [resolvable:$true] %s18_s13 }
   0x3   :  { %21 = dma.hbm_to_vmem [thread:$0]  %s17_s11, 512, %s19_s13, [#allocation3]  }
   0x4   :  { %219 = dma.done.wait [#allocation3], 512  }
   0x5   :  { %220 = vsyncadd [#allocation3], 4294966784  ;;  %v224_v0 = vmov 0   ;;  %v30_v1 = vld [vmem:[%s282_s0] sm:$0xff]  ;;  %v249_v3 = vld [vmem:[#allocation2 + $0x8] sm:$0xff]  ;;  %v34_v54 = vlaneseq  ;;  %s225_s0 = smov [#allocation5]  }
   0x6   :  { %162 = vset.pattern.permute.xlu0 %v224_v0  ;;  %v247_v2 = vld [vmem:[#allocation2] sm:$0xff]  ;;  %v251_v4 = vld [vmem:[#allocation2 + $0x10] sm:$0xff]  ;;  %v253_v5 = vld [vmem:[#allocation2 + $0x18] sm:$0xff]  ;;  %v47_v7 = vmul.f32 %v249_v3, %v249_v3  ;;  %v103_v56 = vmul.f32 0.87758255, %v249_v3  ;;  %s143_s1 = sshll.u32 %s225_s0, 4  ;;  %s144_s1 = int_to_ptr.vmem [resolvable:$true] %s143_s1 }
   0x7   :  { %40 = vperm.xlu0 %162, %v30_v1   ;;  %v46_v6 = vmul.f32 %v247_v2, %v247_v2  ;;  %v48_v8 = vmul.f32 %v251_v4, %v251_v4  ;;  %v49_v9 = vmul.f32 %v253_v5, %v253_v5  ;;  %v102_v55 = vmul.f32 0.87758255, %v247_v2  ;;  %s145_s18 = sshll.u32 %s284_s2, 4  ;;  %s146_s18 = int_to_ptr.hbm [resolvable:$true] %s145_s18 }
   0x8   :  { %v51_v11 = vsub.f32 1.0, %v47_v7  ;;  %v104_v57 = vmul.f32 0.87758255, %v251_v4  ;;  %v105_v61 = vmul.f32 0.87758255, %v253_v5  ;;  %v35_v63 = vand.u32 127, %v34_v54 }
   0x9   :  { %v50_v10 = vsub.f32 1.0, %v46_v6  ;;  %v52_v12 = vsub.f32 1.0, %v48_v8  ;;  %v53_v13 = vsub.f32 1.0, %v49_v9  ;;  %vm114_vm8 = vcmp.gt.f32.partialorder %v247_v2, -0.87758255 }
   0xa   :  { %vm73_vm1 = vcmp.eq.f32.partialorder %v51_v11, inf  ;;  %vm75_vm5 = vcmp.eq.f32.partialorder %v51_v11, 0.0  ;;  %v76_v44 = vand.u32 2147483648, %v51_v11  ;;  %v155_v7 = vadd.f32 -0.23971277, %v247_v2 }
   0xb   :  { %163 = vrsqrt.f32 %v50_v10  ;;  %vm61_vm0 = vcmp.eq.f32.partialorder %v50_v10, inf  ;;  %vm85_vm2 = vcmp.eq.f32.partialorder %v52_v12, inf  ;;  %v64_v43 = vand.u32 2147483648, %v50_v10 }
   0xc   :  { %165 = vrsqrt.f32 %v51_v11  ;;  %vm97_vm3 = vcmp.eq.f32.partialorder %v53_v13, inf  ;;  %vm63_vm4 = vcmp.eq.f32.partialorder %v50_v10, 0.0  ;;  %v88_v45 = vand.u32 2147483648, %v52_v12 }
   0xd   :  { %167 = vrsqrt.f32 %v52_v12  ;;  %vm87_vm6 = vcmp.eq.f32.partialorder %v52_v12, 0.0  ;;  %v100_v48 = vand.u32 2147483648, %v53_v13  ;;  %vm99_vm7 = vcmp.eq.f32.partialorder %v53_v13, 0.0 }
   0xe   :  { %169 = vrsqrt.f32 %v53_v13  ;;  %v156_v9 = vadd.f32 -0.23971277, %v249_v3  ;;  %vm115_vm9 = vcmp.gt.f32.partialorder %v249_v3, -0.87758255  ;;  %vm116_vm10 = vcmp.gt.f32.partialorder %v251_v4, -0.87758255 }
   0xf   :  { %vm117_vm11 = vcmp.gt.f32.partialorder %v253_v5, -0.87758255 }
  0x11   :  { %v164_v14 = vpop.eup %163 }
  0x12   :  { %v166_v15 = vpop.eup %165  ;;  %v55_v18 = vmul.f32 %v164_v14, %v50_v10 }
  0x13   :  { %v168_v16 = vpop.eup %167  ;;  %v67_v19 = vmul.f32 %v166_v15, %v51_v11 }
  0x14   :  { %v170_v17 = vpop.eup %169  ;;  %v79_v20 = vmul.f32 %v168_v16, %v52_v12  ;;  %v56_v22 = vmul.f32 %v164_v14, %v55_v18 }
  0x15   :  { %v91_v21 = vmul.f32 %v170_v17, %v53_v13  ;;  %v68_v23 = vmul.f32 %v166_v15, %v67_v19 }
  0x16   :  { %v80_v24 = vmul.f32 %v168_v16, %v79_v20  ;;  %v57_v26 = vmul.f32 0.5, %v56_v22 }
  0x17   :  { %v92_v25 = vmul.f32 %v170_v17, %v91_v21  ;;  %v69_v27 = vmul.f32 0.5, %v68_v23 }
  0x18   :  { %v81_v28 = vmul.f32 0.5, %v80_v24  ;;  %v58_v30 = vsub.f32 1.5, %v57_v26 }
  0x19   :  { %v93_v29 = vmul.f32 0.5, %v92_v25  ;;  %v70_v31 = vsub.f32 1.5, %v69_v27 }
  0x1a   :  { %v82_v32 = vsub.f32 1.5, %v81_v28  ;;  %v59_v34 = vmul.f32 %v164_v14, %v58_v30  ;;  %v38_v14 = vadd.s32 384, %v35_v63 }
  0x1b   :  { %v94_v33 = vsub.f32 1.5, %v93_v29  ;;  %v71_v35 = vmul.f32 %v166_v15, %v70_v31 }
  0x1c   :  { %v83_v36 = vmul.f32 %v168_v16, %v82_v32  ;;  %v60_v38 = vmul.f32 %v59_v34, %v50_v10 }
  0x1d   :  { %v95_v37 = vmul.f32 %v170_v17, %v94_v33  ;;  %v72_v39 = vmul.f32 %v71_v35, %v51_v11 }
  0x1e   :  { %v84_v40 = vmul.f32 %v83_v36, %v52_v12  ;;  %v62_v42 = vsel %vm61_vm0, %v50_v10, %v60_v38  ;;  %v157_v10 = vadd.f32 -0.23971277, %v251_v4 }
  0x1f   :  { %v96_v41 = vmul.f32 %v95_v37, %v53_v13  ;;  %v74_v46 = vsel %vm73_vm1, %v51_v11, %v72_v39  ;;  %v65_v50 = vsel %vm63_vm4, %v64_v43, %v62_v42  ;;  %v158_v11 = vadd.f32 -0.23971277, %v253_v5 }
  0x20   :  { %v86_v47 = vsel %vm85_vm2, %v52_v12, %v84_v40  ;;  %v77_v51 = vsel %vm75_vm5, %v76_v44, %v74_v46  ;;  %v106_v58 = vmul.f32 0.47942555, %v65_v50  ;;  %v36_v12 = vadd.s32 128, %v35_v63 }
  0x21   :  { %v98_v49 = vsel %vm97_vm3, %v53_v13, %v96_v41  ;;  %v89_v52 = vsel %vm87_vm6, %v88_v45, %v86_v47  ;;  %v107_v59 = vmul.f32 0.47942555, %v77_v51  ;;  %v37_v13 = vadd.s32 256, %v35_v63 }
  0x22   :  { %v101_v53 = vsel %vm99_vm7, %v100_v48, %v98_v49  ;;  %v108_v60 = vmul.f32 0.47942555, %v89_v52  ;;  %v110_v0 = vsub.f32 %v102_v55, %v106_v58 }
  0x23   :  { %v109_v62 = vmul.f32 0.47942555, %v101_v53  ;;  %v111_v1 = vsub.f32 %v103_v56, %v107_v59 }
  0x24   :  { %v112_v6 = vsub.f32 %v104_v57, %v108_v60  ;;  %v122_v15 = vsel %vm114_vm8, %v110_v0, %v155_v7 }
  0x25   :  { %v113_v8 = vsub.f32 %v105_v61, %v109_v62  ;;  %v123_v16 = vsel %vm115_vm9, %v111_v1, %v156_v9 }
  0x26   :  { %v124_v17 = vsel %vm116_vm10, %v112_v6, %v157_v10 }
  0x27   :  { %v125_v18 = vsel %vm117_vm11, %v113_v8, %v158_v11 }
  0x79   :  { %v41_v19 = vpop.permute.xlu0 %40 }
  0x7a   :  { %vm42_vm12 = vcmp.eq.s32.totalorder %v35_v63, %v41_v19  ;;  %vm43_vm13 = vcmp.eq.s32.totalorder %v36_v12, %v41_v19  ;;  %vm44_vm14 = vcmp.eq.s32.totalorder %v37_v13, %v41_v19  ;;  %vm45_vm15 = vcmp.eq.s32.totalorder %v38_v14, %v41_v19 }
  0x7b   :  { %v126_v20 = vsel %vm42_vm12, %v122_v15, %v247_v2  ;;  %v127_v21 = vsel %vm43_vm13, %v123_v16, %v249_v3  ;;  %v128_v22 = vsel %vm44_vm14, %v124_v17, %v251_v4  ;;  %v129_v23 = vsel %vm45_vm15, %v125_v18, %v253_v5 }
  0x7c   :  { %v130_v24 = vmul.f32 64.0, %v126_v20  ;;  %v131_v25 = vmul.f32 64.0, %v127_v21  ;;  %v132_v26 = vmul.f32 64.0, %v128_v22  ;;  %v133_v27 = vmul.f32 64.0, %v129_v23 }
  0x7e   :  { %134 = vst [vmem:[#allocation5] sm:$0xff] %v130_v24 }
  0x7f   :  { %135 = vst [vmem:[#allocation5 + $0x8] sm:$0xff] %v131_v25 }
  0x80   :  { %136 = vst [vmem:[#allocation5 + $0x10] sm:$0xff] %v132_v26 }
  0x81   :  { %137 = vst [vmem:[#allocation5 + $0x18] sm:$0xff] %v133_v27 }
  0x82   :  { %148 = dma.vmem_to_hbm [thread:$0]  %s144_s1, 512, %s146_s18, [#allocation4]  }
  0x83   :  { %221 = dma.done.wait [#allocation4], 512  }
  0x84   :  { %222 = vsyncadd [#allocation4], 4294966784 }
  0x85   :  { %153 = vsyncpa [#allocation3], 1 }
  0x86   :  { %154 = vsyncpa [#allocation4], 1 }

</bundles_post_ra>
